<compile_context>
chip_gen: v6e
topology: v6e:2x2x1
jax: 0.10.0
libtpu: 0.0.40
codegen_flags: <defaults>
</compile_context>

<pallas_src>
import jax
import jax.numpy as jnp
from jax.experimental import pallas as pl
from jax.experimental.pallas import tpu as pltpu


# ----------------------------------------------------------------------------
# Kernel: both Q-networks in one body (column-fused / block-diagonal weights).
# ----------------------------------------------------------------------------
def _twin_q_kernel(s_ref, a_ref, w1s_ref, w1a_ref, b1_ref,
                   w2_ref, b2_ref, w3_ref, b3_ref, out_ref):
    # Layer 1 (input = [state | action], split to avoid an HBM concat):
    h1 = jnp.dot(s_ref[...], w1s_ref[...], preferred_element_type=jnp.float32)
    h1 = h1 + jnp.dot(a_ref[...], w1a_ref[...], preferred_element_type=jnp.float32)
    h1 = jnp.maximum(h1 + b1_ref[...], 0.0)                      # (tm, 2H)
    # Layer 2 (block-diagonal -> both nets in one lane-dense matmul):
    h2 = jnp.dot(h1, w2_ref[...], preferred_element_type=jnp.float32)
    h2 = jnp.maximum(h2 + b2_ref[...], 0.0)                      # (tm, 2H)
    # Layer 3 (both heads folded into one (2H, 2) matmul):
    q = jnp.dot(h2, w3_ref[...], preferred_element_type=jnp.float32) + b3_ref[...]
    out_ref[...] = q.astype(out_ref.dtype)                       # (tm, 2)


# ----------------------------------------------------------------------------
# Wrapper
# ----------------------------------------------------------------------------
def critic_forward(state, action, fused_params, *, block_b=512):
    """Pallas equivalent of Critic.forward(state, action) -> (Q1, Q2)."""
    w1s, w1a, b1, w2, b2, w3, b3 = fused_params
    state = state.astype(jnp.float32)
    action = action.astype(jnp.float32)
    B, S = state.shape
    A = action.shape[1]
    H2 = w2.shape[0]                       # 2 * hidden_size

    # Batch tile: whole batch when it fits one block, otherwise a large
    # sublane-aligned tile (bigger tiles amortize per-step overhead).
    tile = max(8, (block_b // 8) * 8)
    tm = B if B <= tile else tile
    grid = (pl.cdiv(B, tm),)
    const = lambda i: (0, 0)               # weights: same block every step

    out = pl.pallas_call(
        _twin_q_kernel,
        out_shape=jax.ShapeDtypeStruct((B, 2), jnp.float32),
        grid_spec=pltpu.PrefetchScalarGridSpec(
            num_scalar_prefetch=0,
            grid=grid,
            in_specs=[
                pl.BlockSpec((tm, S), lambda i: (i, 0)),   # state
                pl.BlockSpec((tm, A), lambda i: (i, 0)),   # action
                pl.BlockSpec((S, H2), const),              # W1 (state rows)
                pl.BlockSpec((A, H2), const),              # W1 (action rows)
                pl.BlockSpec((1, H2), const),              # b1
                pl.BlockSpec((H2, H2), const),             # W2 (block-diag)
                pl.BlockSpec((1, H2), const),              # b2
                pl.BlockSpec((H2, 2), const),              # W3 (block-diag heads)
                pl.BlockSpec((1, 2), const),               # b3
            ],
            out_specs=pl.BlockSpec((tm, 2), lambda i: (i, 0)),
        ),
        compiler_params=pltpu.CompilerParams(
            dimension_semantics=("parallel",)),
    )(state, action, w1s, w1a, b1, w2, b2, w3, b3)

    return out[:, 0:1], out[:, 1:2]        # (Q1, Q2), each (B, 1)


def critic_Q1(state, action, fused_params, **kw):
    """Pallas equivalent of Critic.Q1(state, action) -> Q1."""
    return critic_forward(state, action, fused_params, **kw)[0]


# ----------------------------------------------------------------------------
# Parameter construction (PyTorch-like per-net init + one-time fusion)
# ----------------------------------------------------------------------------
def _init_linear(key, fan_in, fan_out):
    """Mimics torch.nn.Linear default init: U[-1/sqrt(in), 1/sqrt(in)].
    Stored as (in, out) so the math is x @ W (== x @ W_pt.T)."""
    kw, kb = jax.random.split(key)
    bound = 1.0 / jnp.sqrt(jnp.float32(fan_in))
    w = jax.random.uniform(kw, (fan_in, fan_out), jnp.float32, -bound, bound)
    b = jax.random.uniform(kb, (1, fan_out), jnp.float32, -bound, bound)
    return w, b


def init_critic_params(key, state_size, action_size, hidden_size):
    in_dim = state_size + action_size
    keys = jax.random.split(key, 6)
    q1 = (*_init_linear(keys[0], in_dim, hidden_size),
          *_init_linear(keys[1], hidden_size, hidden_size),
          *_init_linear(keys[2], hidden_size, 1))
    q2 = (*_init_linear(keys[3], in_dim, hidden_size),
          *_init_linear(keys[4], hidden_size, hidden_size),
          *_init_linear(keys[5], hidden_size, 1))
    return q1, q2


def fuse_critic_params(q1_params, q2_params, state_size):
    """One-time fusion of the two Q-nets into column-fused / block-diagonal
    weights consumed by the single Pallas kernel."""
    w1a_, b1a_, w2a_, b2a_, w3a_, b3a_ = q1_params
    w1b_, b1b_, w2b_, b2b_, w3b_, b3b_ = q2_params
    H = w2a_.shape[0]

    # Layer 1: shared input -> concatenate output columns; split state/action rows.
    w1 = jnp.concatenate([w1a_, w1b_], axis=1)            # (S+A, 2H)
    w1s = w1[:state_size, :]                               # (S, 2H)
    w1a = w1[state_size:, :]                               # (A, 2H)
    b1 = jnp.concatenate([b1a_, b1b_], axis=1)             # (1, 2H)

    # Layer 2: block-diagonal so each net only sees its own columns.
    w2 = jnp.zeros((2 * H, 2 * H), jnp.float32)
    w2 = w2.at[:H, :H].set(w2a_).at[H:, H:].set(w2b_)      # (2H, 2H)
    b2 = jnp.concatenate([b2a_, b2b_], axis=1)             # (1, 2H)

    # Layer 3: two (H,1) heads -> one (2H, 2) block-diagonal matrix.
    w3 = jnp.zeros((2 * H, 2), jnp.float32)
    w3 = w3.at[:H, 0:1].set(w3a_).at[H:, 1:2].set(w3b_)    # (2H, 2)
    b3 = jnp.concatenate([b3a_, b3b_], axis=1)             # (1, 2)

    return (w1s, w1a, b1, w2, b2, w3, b3)


def _reference_q(sa, params):
    """Plain-JAX per-net reference for the correctness check."""
    w1, b1, w2, b2, w3, b3 = params
    h1 = jnp.maximum(sa @ w1 + b1, 0.0)
    h2 = jnp.maximum(h1 @ w2 + b2, 0.0)
    return h2 @ w3 + b3


# ----------------------------------------------------------------------------
# Demo / self-test
# ----------------------------------------------------------------------------
if __name__ == "__main__":
    # Small, forward-consistent shapes: env.state_size=8, env.action_size=4,
    # hidden_size=32, batch=8.
    BATCH, STATE_SIZE, ACTION_SIZE, HIDDEN = 8, 8, 4, 32

    key = jax.random.PRNGKey(0)
    k_param, k_state, k_action = jax.random.split(key, 3)

    q1_params, q2_params = init_critic_params(k_param, STATE_SIZE, ACTION_SIZE, HIDDEN)
    fused_params = fuse_critic_params(q1_params, q2_params, STATE_SIZE)

    state = jax.random.normal(k_state, (BATCH, STATE_SIZE), jnp.float32)
    action = jax.random.normal(k_action, (BATCH, ACTION_SIZE), jnp.float32)

    # --- single-block path -------------------------------------------------
    q1, q2 = critic_forward(state, action, fused_params)
    q1 = jax.block_until_ready(q1)
    q2 = jax.block_until_ready(q2)

    sa = jnp.concatenate([state, action], axis=1)
    ref_q1 = _reference_q(sa, q1_params)
    ref_q2 = _reference_q(sa, q2_params)
    assert q1.shape == (BATCH, 1) and q2.shape == (BATCH, 1)
    assert jnp.allclose(q1, ref_q1, atol=1e-5, rtol=1e-5)
    assert jnp.allclose(q2, ref_q2, atol=1e-5, rtol=1e-5)

    # --- multi-step grid + partial last batch tile --------------------------
    B2 = 20
    k_s2, k_a2 = jax.random.split(jax.random.PRNGKey(1))
    state2 = jax.random.normal(k_s2, (B2, STATE_SIZE), jnp.float32)
    action2 = jax.random.normal(k_a2, (B2, ACTION_SIZE), jnp.float32)
    q1b, q2b = critic_forward(state2, action2, fused_params, block_b=8)
    q1b = jax.block_until_ready(q1b)
    q2b = jax.block_until_ready(q2b)
    sa2 = jnp.concatenate([state2, action2], axis=1)
    assert jnp.allclose(q1b, _reference_q(sa2, q1_params), atol=1e-5, rtol=1e-5)
    assert jnp.allclose(q2b, _reference_q(sa2, q2_params), atol=1e-5, rtol=1e-5)

    print("KERNEL_OK")
</pallas_src>

<mosaic_0001>
module attributes {stable_mosaic.version = 11 : i64} {
  func.func @_twin_q_kernel(%arg0: i32, %arg1: memref<8x8xf32, #tpu.memory_space<vmem>>, %arg2: memref<8x4xf32, #tpu.memory_space<vmem>>, %arg3: memref<8x64xf32, #tpu.memory_space<vmem>>, %arg4: memref<4x64xf32, #tpu.memory_space<vmem>>, %arg5: memref<1x64xf32, #tpu.memory_space<vmem>>, %arg6: memref<64x64xf32, #tpu.memory_space<vmem>>, %arg7: memref<1x64xf32, #tpu.memory_space<vmem>>, %arg8: memref<64x2xf32, #tpu.memory_space<vmem>>, %arg9: memref<1x2xf32, #tpu.memory_space<vmem>>, %arg10: memref<8x2xf32, #tpu.memory_space<vmem>>) attributes {dimension_semantics = [#tpu.dimension_semantics<parallel>], iteration_bounds = array<i64: 1>, scalar_prefetch = 0 : i64, scratch_operands = 0 : i64, tpu.core_type = #tpu.core_type<tc>, window_params = [{transform_indices = @transform_0, window_bounds = array<i64: 8, 8>}, {transform_indices = @transform_1, window_bounds = array<i64: 8, 4>}, {pipeline_mode = #tpu.pipeline_mode<synchronous>, transform_indices = @transform_2, window_bounds = array<i64: 8, 64>}, {pipeline_mode = #tpu.pipeline_mode<synchronous>, transform_indices = @transform_3, window_bounds = array<i64: 4, 64>}, {pipeline_mode = #tpu.pipeline_mode<synchronous>, transform_indices = @transform_4, window_bounds = array<i64: 1, 64>}, {pipeline_mode = #tpu.pipeline_mode<synchronous>, transform_indices = @transform_5, window_bounds = array<i64: 64, 64>}, {pipeline_mode = #tpu.pipeline_mode<synchronous>, transform_indices = @transform_6, window_bounds = array<i64: 1, 64>}, {pipeline_mode = #tpu.pipeline_mode<synchronous>, transform_indices = @transform_7, window_bounds = array<i64: 64, 2>}, {pipeline_mode = #tpu.pipeline_mode<synchronous>, transform_indices = @transform_8, window_bounds = array<i64: 1, 2>}, {transform_indices = @transform_9, window_bounds = array<i64: 8, 2>}]} {
    %c0 = arith.constant 0 : index
    %c0_0 = arith.constant 0 : index
    %0 = vector.load %arg1[%c0, %c0_0] : memref<8x8xf32, #tpu.memory_space<vmem>>, vector<8x8xf32>
    %c0_1 = arith.constant 0 : index
    %c0_2 = arith.constant 0 : index
    %1 = vector.load %arg3[%c0_1, %c0_2] : memref<8x64xf32, #tpu.memory_space<vmem>>, vector<8x64xf32>
    %cst = arith.constant dense<0.000000e+00> : vector<8x64xf32>
    %2 = tpu.matmul %0, %1, %cst {dimension_numbers = #tpu.dot_dimension_numbers<[1], [0], [0], [1], [0, 0, 1, 1], [], []>} : vector<8x8xf32>, vector<8x64xf32>, vector<8x64xf32> -> vector<8x64xf32>
    %c0_3 = arith.constant 0 : index
    %c0_4 = arith.constant 0 : index
    %3 = vector.load %arg2[%c0_3, %c0_4] : memref<8x4xf32, #tpu.memory_space<vmem>>, vector<8x4xf32>
    %c0_5 = arith.constant 0 : index
    %c0_6 = arith.constant 0 : index
    %4 = vector.load %arg4[%c0_5, %c0_6] : memref<4x64xf32, #tpu.memory_space<vmem>>, vector<4x64xf32>
    %cst_7 = arith.constant dense<0.000000e+00> : vector<8x64xf32>
    %5 = tpu.matmul %3, %4, %cst_7 {dimension_numbers = #tpu.dot_dimension_numbers<[1], [0], [0], [1], [0, 0, 1, 1], [], []>} : vector<8x4xf32>, vector<4x64xf32>, vector<8x64xf32> -> vector<8x64xf32>
    %6 = arith.addf %2, %5 : vector<8x64xf32>
    %c0_8 = arith.constant 0 : index
    %c0_9 = arith.constant 0 : index
    %7 = vector.load %arg5[%c0_8, %c0_9] : memref<1x64xf32, #tpu.memory_space<vmem>>, vector<1x64xf32>
    %8 = vector.broadcast %7 : vector<1x64xf32> to vector<8x64xf32>
    %9 = arith.addf %6, %8 : vector<8x64xf32>
    %cst_10 = arith.constant 0.000000e+00 : f32
    %10 = vector.broadcast %cst_10 : f32 to vector<8x64xf32>
    %11 = arith.maximumf %9, %10 : vector<8x64xf32>
    %c0_11 = arith.constant 0 : index
    %c0_12 = arith.constant 0 : index
    %12 = vector.load %arg6[%c0_11, %c0_12] : memref<64x64xf32, #tpu.memory_space<vmem>>, vector<64x64xf32>
    %cst_13 = arith.constant dense<0.000000e+00> : vector<8x64xf32>
    %13 = tpu.matmul %11, %12, %cst_13 {dimension_numbers = #tpu.dot_dimension_numbers<[1], [0], [0], [1], [0, 0, 1, 1], [], []>} : vector<8x64xf32>, vector<64x64xf32>, vector<8x64xf32> -> vector<8x64xf32>
    %c0_14 = arith.constant 0 : index
    %c0_15 = arith.constant 0 : index
    %14 = vector.load %arg7[%c0_14, %c0_15] : memref<1x64xf32, #tpu.memory_space<vmem>>, vector<1x64xf32>
    %15 = vector.broadcast %14 : vector<1x64xf32> to vector<8x64xf32>
    %16 = arith.addf %13, %15 : vector<8x64xf32>
    %cst_16 = arith.constant 0.000000e+00 : f32
    %17 = vector.broadcast %cst_16 : f32 to vector<8x64xf32>
    %18 = arith.maximumf %16, %17 : vector<8x64xf32>
    %c0_17 = arith.constant 0 : index
    %c0_18 = arith.constant 0 : index
    %19 = vector.load %arg8[%c0_17, %c0_18] : memref<64x2xf32, #tpu.memory_space<vmem>>, vector<64x2xf32>
    %cst_19 = arith.constant dense<0.000000e+00> : vector<8x2xf32>
    %20 = tpu.matmul %18, %19, %cst_19 {dimension_numbers = #tpu.dot_dimension_numbers<[1], [0], [0], [1], [0, 0, 1, 1], [], []>} : vector<8x64xf32>, vector<64x2xf32>, vector<8x2xf32> -> vector<8x2xf32>
    %c0_20 = arith.constant 0 : index
    %c0_21 = arith.constant 0 : index
    %21 = vector.load %arg9[%c0_20, %c0_21] : memref<1x2xf32, #tpu.memory_space<vmem>>, vector<1x2xf32>
    %22 = vector.broadcast %21 : vector<1x2xf32> to vector<8x2xf32>
    %23 = arith.addf %20, %22 : vector<8x2xf32>
    %c0_22 = arith.constant 0 : index
    %c0_23 = arith.constant 0 : index
    %24 = vector.load %arg10[%c0_22, %c0_23] : memref<8x2xf32, #tpu.memory_space<vmem>>, vector<8x2xf32>
    tpu.vector_store %arg10[%c0_22, %c0_23], %23 {strides = array<i32>} : memref<8x2xf32, #tpu.memory_space<vmem>>, vector<8x2xf32>,
    return
  }
  func.func @transform_0(%arg0: i32) -> (i32, i32) {
    %c0_i32 = arith.constant 0 : i32
    %c0_i32_0 = arith.constant 0 : i32
    return %arg0, %c0_i32 : i32, i32
  }
  func.func @transform_1(%arg0: i32) -> (i32, i32) {
    %c0_i32 = arith.constant 0 : i32
    %c0_i32_0 = arith.constant 0 : i32
    return %arg0, %c0_i32 : i32, i32
  }
  func.func @transform_2(%arg0: i32) -> (i32, i32) {
    %c0_i32 = arith.constant 0 : i32
    %c0_i32_0 = arith.constant 0 : i32
    %c0_i32_1 = arith.constant 0 : i32
    return %c0_i32, %c0_i32_0 : i32, i32
  }
  func.func @transform_3(%arg0: i32) -> (i32, i32) {
    %c0_i32 = arith.constant 0 : i32
    %c0_i32_0 = arith.constant 0 : i32
    %c0_i32_1 = arith.constant 0 : i32
    return %c0_i32, %c0_i32_0 : i32, i32
  }
  func.func @transform_4(%arg0: i32) -> (i32, i32) {
    %c0_i32 = arith.constant 0 : i32
    %c0_i32_0 = arith.constant 0 : i32
    %c0_i32_1 = arith.constant 0 : i32
    return %c0_i32, %c0_i32_0 : i32, i32
  }
  func.func @transform_5(%arg0: i32) -> (i32, i32) {
    %c0_i32 = arith.constant 0 : i32
    %c0_i32_0 = arith.constant 0 : i32
    %c0_i32_1 = arith.constant 0 : i32
    return %c0_i32, %c0_i32_0 : i32, i32
  }
  func.func @transform_6(%arg0: i32) -> (i32, i32) {
    %c0_i32 = arith.constant 0 : i32
    %c0_i32_0 = arith.constant 0 : i32
    %c0_i32_1 = arith.constant 0 : i32
    return %c0_i32, %c0_i32_0 : i32, i32
  }
  func.func @transform_7(%arg0: i32) -> (i32, i32) {
    %c0_i32 = arith.constant 0 : i32
    %c0_i32_0 = arith.constant 0 : i32
    %c0_i32_1 = arith.constant 0 : i32
    return %c0_i32, %c0_i32_0 : i32, i32
  }
  func.func @transform_8(%arg0: i32) -> (i32, i32) {
    %c0_i32 = arith.constant 0 : i32
    %c0_i32_0 = arith.constant 0 : i32
    %c0_i32_1 = arith.constant 0 : i32
    return %c0_i32, %c0_i32_0 : i32, i32
  }
  func.func @transform_9(%arg0: i32) -> (i32, i32) {
    %c0_i32 = arith.constant 0 : i32
    %c0_i32_0 = arith.constant 0 : i32
    return %arg0, %c0_i32 : i32, i32
  }
}

</mosaic_0001>

<bundles_post_ra>
// kernel: tpu_custom_call.1
= control target key start
LH: loop header
LB: loop body
LE: loop exit
PB: predicated region body
PF: predicated region fallthrough
CT: control target
= control target key end

     0   :  { %vm40_vm0 = vcmask 1043456   ;;  %v461_v0 = vmov 0.0   ;;  %vm36_vm1 = vcmask 31744   ;;  %vm114_vm2 = vcmask 64512   ;;  %s609_s3 = inlined_call_operand.vmem [shape: f32[4,64], index: 3, kind: input, shape index: {}]   ;;  %s610_s2 = inlined_call_operand.vmem [shape: f32[8,64], index: 2, kind: input, shape index: {}]   ;;  %s611_s1 = inlined_call_operand.vmem [shape: f32[8,4], index: 1, kind: input, shape index: {}]   ;;  %s612_s0 = inlined_call_operand.vmem [shape: f32[8,8], index: 0, kind: input, shape index: {}]   ;;  %s613_s5 = inlined_call_operand.vmem [shape: f32[64,64], index: 5, kind: input, shape index: {}]   ;;  %s614_s7 = inlined_call_operand.vmem [shape: f32[64,2], index: 7, kind: input, shape index: {}]   ;;  %s615_s4 = inlined_call_operand.vmem [shape: f32[1,64], index: 4, kind: input, shape index: {}]   ;;  %s616_s6 = inlined_call_operand.vmem [shape: f32[1,64], index: 6, kind: input, shape index: {}]   ;;  %s617_s8 = inlined_call_operand.vmem [shape: f32[1,2], index: 8, kind: input, shape index: {}]   ;;  %s618_s9 = inlined_call_operand.vmem [shape: f32[8,2], index: 9, kind: output, shape index: {}]  }
   0x1   :  { %411 = vmatprep.subr.mxu0 %v461_v0  ;;  %416 = vmatprep.subr.mxu1 %v461_v0  ;;  %v35_v1 = vld [vmem:[%s609_s3] sm:$0xf]  ;;  %vm462_vm3 = vmmov 0   ;;  %v204_v5 = vld [vmem:[%s613_s5 + $0x38] sm:$0xff]  ;;  %v203_v6 = vld [vmem:[%s613_s5 + $0x30] sm:$0xff]  ;;  %vm212_vm4 = vcmask 523264  }
   0x2   :  { %v33_v2 = vld [vmem:[%s610_s2] sm:$0xff]  ;;  %412 = vmatpush3.msk.msra.mxu0 %vm40_vm0, %v35_v1  ;;  %413 = vmatprep.mubr.msk.f32.mxu0 %vm462_vm3, %v461_v0  ;;  %v202_v7 = vld [vmem:[%s613_s5 + $0x28] sm:$0xff]  ;;  %v200_v9 = vld [vmem:[%s613_s5 + $0x18] sm:$0xff]  ;;  %vm375_vm5 = vcmask 15360  }
   0x3   :  { %v34_v3 = vld [vmem:[%s611_s1] sm:$0xff]  ;;  %417 = vmatpush3.msra.mxu1 %v33_v2  ;;  %418 = vmatprep.mubr.msk.f32.mxu1 %vm462_vm3, %v461_v0  ;;  %v199_v10 = vld [vmem:[%s613_s5 + $0x10] sm:$0xff]  ;;  %v198_v11 = vld [vmem:[%s613_s5 + $0x8] sm:$0xff] }
   0x4   :  { %v32_v4 = vld [vmem:[%s612_s0] sm:$0xff]  ;;  %414 = vmatmul.mubr.msk.f32.vlgmr.msra.gmra.mxu0 %vm36_vm1, %v34_v3  ;;  %421 = vmatprep.subr.mxu0 %v461_v0  ;;  %v294_v13 = vld [vmem:[%s614_s7 + $0x38] sm:$0xff]  ;;  %v293_v14 = vld [vmem:[%s614_s7 + $0x30] sm:$0xff] }
   0x5   :  { %419 = vmatmul.mubr.msk.f32.vlgmr.msra.gmra.mxu1 %vm114_vm2, %v32_v4  ;;  %437 = vmatprep.mubr.msk.f32.mxu0 %vm462_vm3, %v461_v0  ;;  %v201_v8 = vld [vmem:[%s613_s5 + $0x20] sm:$0xff]  ;;  %v292_v15 = vld [vmem:[%s614_s7 + $0x28] sm:$0xff]  ;;  %v290_v17 = vld [vmem:[%s614_s7 + $0x18] sm:$0xff] }
   0x6   :  { %422 = vmatpush3.msra.mxu0 %v204_v5  ;;  %440 = vmatprep.subr.mxu1 %v461_v0  ;;  %v197_v12 = vld [vmem:[%s613_s5] sm:$0xff]  ;;  %v289_v26 = vld [vmem:[%s614_s7 + $0x10] sm:$0xff]  ;;  %v288_v27 = vld [vmem:[%s614_s7 + $0x8] sm:$0xff] }
   0x7   :  { %423 = vmatprep.subr.mxu0 %v461_v0  ;;  %456 = vmatprep.mubr.msk.f32.mxu1 %vm462_vm3, %v461_v0  ;;  %v291_v16 = vld [vmem:[%s614_s7 + $0x20] sm:$0xff] }
   0x8   :  { %424 = vmatpush3.msra.mxu0 %v203_v6  ;;  %441 = vmatpush3.msra.mxu1 %v294_v13  ;;  %v384_v20 = vld [vmem:[%s615_s4] ss:$0 sm:$0xff] }
   0x9   :  { %425 = vmatprep.subr.mxu0 %v461_v0  ;;  %442 = vmatprep.subr.mxu1 %v461_v0  ;;  %v287_v28 = vld [vmem:[%s614_s7] sm:$0xff] }
   0xa   :  { %426 = vmatpush3.msra.mxu0 %v202_v7  ;;  %443 = vmatpush3.msra.mxu1 %v293_v14  ;;  %v385_v29 = vld [vmem:[%s616_s6] ss:$0 sm:$0xff] }
   0xb   :  { %427 = vmatprep.subr.mxu0 %v461_v0  ;;  %444 = vmatprep.subr.mxu1 %v461_v0  ;;  %v387_v34 = vld [vmem:[%s617_s8] ss:$0 sm:$0xff] }
   0xc   :  { %428 = vmatpush3.msra.mxu0 %v201_v8  ;;  %445 = vmatpush3.msra.mxu1 %v292_v15 }
   0xd   :  { %429 = vmatprep.subr.mxu0 %v461_v0  ;;  %446 = vmatprep.subr.mxu1 %v461_v0 }
   0xe   :  { %430 = vmatpush3.msra.mxu0 %v200_v9  ;;  %447 = vmatpush3.msra.mxu1 %v291_v16 }
   0xf   :  { %431 = vmatprep.subr.mxu0 %v461_v0  ;;  %448 = vmatprep.subr.mxu1 %v461_v0 }
  0x10   :  { %432 = vmatpush3.msra.mxu0 %v199_v10  ;;  %449 = vmatpush3.msra.mxu1 %v290_v17 }
  0x11   :  { %433 = vmatprep.subr.mxu0 %v461_v0  ;;  %450 = vmatprep.subr.mxu1 %v461_v0 }
  0x12   :  { %434 = vmatpush3.msra.mxu0 %v198_v11  ;;  %451 = vmatpush3.msra.mxu1 %v289_v26 }
  0x13   :  { %435 = vmatprep.subr.mxu0 %v461_v0  ;;  %452 = vmatprep.subr.mxu1 %v461_v0 }
  0x14   :  { %436 = vmatpush3.msra.mxu0 %v197_v12  ;;  %453 = vmatpush3.msra.mxu1 %v288_v27 }
  0x15   :  { %454 = vmatprep.subr.mxu1 %v461_v0 }
  0x16   :  { %455 = vmatpush3.msra.mxu1 %v287_v28 }
  0xc4   :  { %v110_v18 = vpop.f32.mrf.mxu0 }
  0xc5   :  { %v184_v19 = vpop.f32.mrf.mxu1 }
  0xc6   :  { %v185_v21 = vadd.f32 %v184_v19, %v110_v18  ;;  %v415_v22 = vpop.f32.mrf.mxu0 }
  0xc7   :  { %v420_v23 = vpop.f32.mrf.mxu1 }
  0xc8   :  { %v195_v24 = vadd.f32 %v384_v20, %v185_v21 }
  0xca   :  { %v196_v25 = vmax.f32 %v195_v24, 0.0 }
  0xcc   :  { %438 = vmatmul.mubr.msk.f32.vlgmr.msra.gmra.mxu0 %vm212_vm4, %v196_v25 }
 0x18c   :  { %v282_v30 = vpop.f32.mrf.mxu0 }
 0x18d   :  { %v283_v31 = vadd.f32 %v385_v29, %v282_v30 }
 0x18e   :  { %v439_v32 = vpop.f32.mrf.mxu0 }
 0x18f   :  { %v286_v33 = vmax.f32 %v283_v31, 0.0 }
 0x191   :  { %457 = vmatmul.mubr.msk.f32.vlgmr.msra.gmra.mxu1 %vm212_vm4, %v286_v33 }
 0x251   :  { %v371_v35 = vpop.f32.mrf.mxu1 }
 0x252   :  { %v372_v36 = vadd.f32 %v387_v34, %v371_v35 }
 0x253   :  { %v458_v37 = vpop.f32.mrf.mxu1 }
 0x254   :  { %376 = vst.msk [vmem:[%s618_s9] sm:$0xff] %vm375_vm5, %v372_v36 }

</bundles_post_ra>
